<compile_context>
chip_gen: v7x
topology: tpu7x:2x2x1
jax: 0.10.0
libtpu: 0.0.40
codegen_flags: <defaults>
</compile_context>

<pallas_src>
import functools

import jax
import jax.numpy as jnp
from jax.experimental import pallas as pl
from jax.experimental.pallas import tpu as pltpu

EPS = 1e-5  # nn.BatchNorm2d default


# ----------------------------- Pallas kernel --------------------------------

def decoder_kernel(ax_ref, wcat_ref, pavg_ref, ws_ref, wc1_ref, wc2_ref, aux_ref,
                   o_ref, *, batch, rows_per_batch):
    """Fully fused Decoderv2 forward on a lane-dense [M, 4*n_out] slab.

    ax_ref  : [M, Kp]   pixel slab = [up features | 4 sub-pixel x features | 1 | 0-pad]
    wcat_ref: [Kp, N]   packed (tr_conv | x_conv | bias) weights, N = 4*n_out
    pavg_ref: [N, N]    group-average projection (per-channel BN stats + broadcast)
    ws_ref  : [N, N]    block-expanded SpatialAttention squeeze weight
    wc1_ref : [N, N]    GAB conv1 weight (folds 4-group pooling), zero-padded columns
    wc2_ref : [N, N]    GAB conv2 weight tiled over the 4 groups, zero-padded rows
    aux_ref : [4, N]    rows: BN gamma, BN beta, GAB bias1 (padded), GAB bias2 (tiled)
    """
    f32 = jnp.float32
    sig = lambda v: 1.0 / (1.0 + jnp.exp(-v))

    # tr_conv + x_conv + bias + channel concat == one MXU matmul.
    cat = jnp.dot(ax_ref[...], wcat_ref[...], preferred_element_type=f32)      # (M, N)

    # BatchNorm2d (training mode, biased variance). Column stats are projected through
    # P_avg to fold the four (di,dj) sub-pixel groups of each channel into true
    # per-channel statistics, already broadcast back to all N columns.
    m_rows = cat.shape[0]
    col_mean = jnp.sum(cat, axis=0, keepdims=True) / m_rows                    # (1, N)
    col_sq = jnp.sum(cat * cat, axis=0, keepdims=True) / m_rows                # (1, N)
    stats = jnp.dot(jnp.concatenate([col_mean, col_sq], axis=0), pavg_ref[...],
                    preferred_element_type=f32)                                # (2, N)
    mean = stats[0:1, :]
    var = jnp.maximum(stats[1:2, :] - mean * mean, 0.0)
    gamma = aux_ref[0:1, :]
    beta = aux_ref[1:2, :]
    y = (cat - mean) * jax.lax.rsqrt(var + EPS) * gamma + beta
    y = jnp.maximum(y, 0.0)                                                    # ReLU

    # SpatialAttention2d: per-(sub)pixel scalar gate; the block-expanded squeeze weight
    # makes the MXU compute + broadcast it across channels in one matmul.
    s = y * sig(jnp.dot(y, ws_ref[...], preferred_element_type=f32))

    # GAB channel attention: per-batch global average pool + 1x1 convs + sigmoid gate.
    y3 = y.reshape(batch, rows_per_batch, y.shape[-1])
    pooled = jnp.sum(y3, axis=1) / rows_per_batch                              # (B, N)
    z1 = jnp.maximum(
        jnp.dot(pooled, wc1_ref[...], preferred_element_type=f32) + aux_ref[2:3, :], 0.0)
    z = sig(jnp.dot(z1, wc2_ref[...], preferred_element_type=f32) + aux_ref[3:4, :])
    c = (y3 * z[:, None, :]).reshape(y.shape)                                  # broadcast per batch

    o_ref[...] = s + c


# ------------------------------ host-side packing ---------------------------

def _pack_params(params, up_in, x_in, n_out):
    """Pack PyTorch-layout weights into lane-dense matrices (pure layout, done once)."""
    G = 4                                  # the 2x2 transposed-conv sub-pixels
    up_out = params['tr_w'].shape[1]
    x_out = params['x_w'].shape[0]
    r = params['c_b1'].shape[0]            # n_out // 16
    N = G * n_out
    K_real = up_in + G * x_in
    K_pad = ((K_real + 1 + 127) // 128) * 128   # +1 for the constant-1 bias column

    # --- combined (tr_conv | x_conv | bias) weight: [K_pad, N], columns (g, channel) ---
    tr_w = params['tr_w']                                        # (up_in, up_out, 2, 2)
    w_up = jnp.zeros((up_in, G, n_out), jnp.float32)
    w_up = w_up.at[:, :, :up_out].set(
        tr_w.reshape(up_in, up_out, G).transpose(0, 2, 1))       # [ci, g, co] = tr_w[ci,co,di,dj]

    wx2 = params['x_w'].reshape(x_out, x_in)                     # (co', c)
    w_xb = jnp.zeros((G, x_in, G, n_out), jnp.float32)
    for g in range(G):                                           # block-diagonal over sub-pixels
        w_xb = w_xb.at[g, :, g, up_out:].set(wx2.T)

    bias_row = jnp.zeros((G, n_out), jnp.float32)
    bias_row = bias_row.at[:, :up_out].set(jnp.broadcast_to(params['tr_b'], (G, up_out)))

    W_cat = jnp.zeros((K_pad, N), jnp.float32)
    W_cat = W_cat.at[:up_in, :].set(w_up.reshape(up_in, N))
    W_cat = W_cat.at[up_in:K_real, :].set(w_xb.reshape(G * x_in, N))
    W_cat = W_cat.at[K_real, :].set(bias_row.reshape(N))         # constant-1 column row

    # --- BN group-average projection: averages the 4 groups per channel and broadcasts ---
    P_avg = jnp.tile(jnp.eye(n_out, dtype=jnp.float32), (G, G)) / G

    # --- SpatialAttention squeeze weight, block-expanded to (N, N) ---
    s_vec = params['s_w'].reshape(n_out)
    W_s = jnp.kron(jnp.eye(G, dtype=jnp.float32),
                   jnp.broadcast_to(s_vec[:, None], (n_out, n_out)))

    # --- GAB weights (pooling over groups folded into conv1; conv2 tiled over groups) ---
    w1 = params['c_w1'].reshape(r, n_out)
    Wc1 = jnp.zeros((N, N), jnp.float32)
    Wc1 = Wc1.at[:, :r].set(jnp.tile(w1.T / G, (G, 1)))
    bc1 = jnp.zeros((N,), jnp.float32).at[:r].set(params['c_b1'])

    w2 = params['c_w2'].reshape(n_out, r)
    Wc2 = jnp.zeros((N, N), jnp.float32)
    Wc2 = Wc2.at[:r, :].set(jnp.tile(w2.T, (1, G)))
    bc2 = jnp.tile(params['c_b2'], G)

    gamma_t = jnp.tile(params['bn_g'], G)
    beta_t = jnp.tile(params['bn_b'], G)
    aux = jnp.stack([gamma_t, beta_t, bc1, bc2], axis=0)         # (4, N)

    return W_cat, P_avg, W_s, Wc1, Wc2, aux, K_pad


# ------------------------------ forward wrapper ------------------------------

def decoderv2_forward(up_p, x_p, params):
    """up_p: (B, up_in, H, W) NCHW; x_p: (B, x_in, 2H, 2W) NCHW -> (B, n_out, 2H, 2W)."""
    B, up_in, H, W = up_p.shape
    _, x_in, H2, W2 = x_p.shape
    assert H2 == 2 * H and W2 == 2 * W
    up_out = params['tr_w'].shape[1]
    n_out = up_out + params['x_w'].shape[0]
    G = 4
    N = G * n_out
    M = B * H * W

    W_cat, P_avg, W_s, Wc1, Wc2, aux, K_pad = _pack_params(params, up_in, x_in, n_out)

    # Boundary layout glue (only place NCHW is touched): build the lane-dense pixel slab.
    # Rows ordered (b, i, j); columns = up features | x features of the 4 sub-pixels | 1.
    U = up_p.transpose(0, 2, 3, 1).reshape(M, up_in)
    Xr = x_p.transpose(0, 2, 3, 1).reshape(B, H, 2, W, 2, x_in)
    Xr = Xr.transpose(0, 1, 3, 2, 4, 5).reshape(M, G * x_in)
    ones = jnp.ones((M, 1), jnp.float32)
    AX = jnp.concatenate([U, Xr, ones], axis=1)
    AX = jnp.pad(AX, ((0, 0), (0, K_pad - AX.shape[1])))

    kernel = functools.partial(decoder_kernel, batch=B, rows_per_batch=H * W)
    out = pl.pallas_call(
        kernel,
        out_shape=jax.ShapeDtypeStruct((M, N), jnp.float32),
        in_specs=[pl.BlockSpec(memory_space=pltpu.MemorySpace.VMEM)] * 7,
        out_specs=pl.BlockSpec(memory_space=pltpu.MemorySpace.VMEM),
    )(AX, W_cat, P_avg, W_s, Wc1, Wc2, aux)

    # Decode (b, i, j) x (di, dj, co) back to NCHW.
    out = out.reshape(B, H, W, 2, 2, n_out).transpose(0, 5, 1, 3, 2, 4)
    return out.reshape(B, n_out, 2 * H, 2 * W)


# --------------------------- pure-JAX reference ------------------------------

def reference_forward(up_p, x_p, p):
    hp = jax.lax.Precision.HIGHEST
    B, up_in, H, W = up_p.shape
    up_out = p['tr_w'].shape[1]
    # ConvTranspose2d(k=2, s=2)
    y = jnp.einsum('bihw,iokl->bohwkl', up_p, p['tr_w'], precision=hp)
    up = y.transpose(0, 1, 2, 4, 3, 5).reshape(B, up_out, 2 * H, 2 * W)
    up = up + p['tr_b'][None, :, None, None]
    # 1x1 x_conv (no bias)
    xw = p['x_w'].reshape(p['x_w'].shape[0], -1)
    xo = jnp.einsum('bchw,oc->bohw', x_p, xw, precision=hp)
    cat = jnp.concatenate([up, xo], axis=1)
    # BN (training mode) + ReLU
    mean = cat.mean(axis=(0, 2, 3), keepdims=True)
    var = ((cat - mean) ** 2).mean(axis=(0, 2, 3), keepdims=True)
    y = (cat - mean) * jax.lax.rsqrt(var + EPS)
    y = y * p['bn_g'][None, :, None, None] + p['bn_b'][None, :, None, None]
    y = jnp.maximum(y, 0.0)
    # SpatialAttention2d
    sw = p['s_w'].reshape(-1)
    s = y * jax.nn.sigmoid(jnp.einsum('bchw,c->bhw', y, sw, precision=hp))[:, None]
    # GAB
    pooled = y.mean(axis=(2, 3))
    w1 = p['c_w1'].reshape(p['c_w1'].shape[0], -1)
    z1 = jnp.maximum(jnp.dot(pooled, w1.T, precision=hp) + p['c_b1'], 0.0)
    w2 = p['c_w2'].reshape(p['c_w2'].shape[0], -1)
    z = jax.nn.sigmoid(jnp.dot(z1, w2.T, precision=hp) + p['c_b2'])
    c = y * z[:, :, None, None]
    return s + c


# --------------------------------- main --------------------------------------

def init_params(key, up_in, x_in, n_out):
    r = n_out // 16
    up_out = x_out = n_out // 2
    ks = jax.random.split(key, 10)
    w = lambda k, s: (0.1 * jax.random.normal(k, s)).astype(jnp.float32)
    return {
        'tr_w': w(ks[0], (up_in, up_out, 2, 2)),   # ConvTranspose2d weight (Cin, Cout, kH, kW)
        'tr_b': w(ks[1], (up_out,)),
        'x_w':  w(ks[2], (x_out, x_in, 1, 1)),
        'bn_g': 1.0 + w(ks[3], (n_out,)),
        'bn_b': w(ks[4], (n_out,)),
        's_w':  w(ks[5], (1, n_out, 1, 1)),
        'c_w1': w(ks[6], (r, n_out, 1, 1)),
        'c_b1': w(ks[7], (r,)),
        'c_w2': w(ks[8], (n_out, r, 1, 1)),
        'c_b2': w(ks[9], (n_out,)),
    }


if __name__ == "__main__":
    up_in, x_in, n_out = 16, 8, 32          # n_out >= 16 so GAB reduction=16 is valid
    B, H, W = 2, 8, 8                        # up_p spatial 8x8 -> output 16x16
    key = jax.random.PRNGKey(0)
    k1, k2, kp = jax.random.split(key, 3)
    up_p = jax.random.normal(k1, (B, up_in, H, W), dtype=jnp.float32)
    x_p = jax.random.normal(k2, (B, x_in, 2 * H, 2 * W), dtype=jnp.float32)
    params = init_params(kp, up_in, x_in, n_out)

    out = jax.block_until_ready(decoderv2_forward(up_p, x_p, params))
    assert out.shape == (B, n_out, 2 * H, 2 * W)
    assert bool(jnp.isfinite(out).all())

    ref = jax.block_until_ready(reference_forward(up_p, x_p, params))
    err = float(jnp.max(jnp.abs(out - ref)))
    assert err < 2e-3, f"max abs err vs reference = {err}"

    # TODO(synk): BatchNorm running-stats update (training-mode side effect) is not modeled;
    # it does not affect the forward output.
    print("KERNEL_OK")
</pallas_src>

<mosaic_0001>
module attributes {stable_mosaic.version = 11 : i64} {
  func.func @decoder_kernel(%arg0: memref<128x128xf32, #tpu.memory_space<vmem>>, %arg1: memref<128x128xf32, #tpu.memory_space<vmem>>, %arg2: memref<128x128xf32, #tpu.memory_space<vmem>>, %arg3: memref<128x128xf32, #tpu.memory_space<vmem>>, %arg4: memref<128x128xf32, #tpu.memory_space<vmem>>, %arg5: memref<128x128xf32, #tpu.memory_space<vmem>>, %arg6: memref<4x128xf32, #tpu.memory_space<vmem>>, %arg7: memref<128x128xf32, #tpu.memory_space<vmem>>) attributes {dimension_semantics = [], scalar_prefetch = 0 : i64, scratch_operands = 0 : i64, tpu.core_type = #tpu.core_type<tc>} {
    %c0 = arith.constant 0 : index
    %c0_0 = arith.constant 0 : index
    %0 = vector.load %arg0[%c0, %c0_0] : memref<128x128xf32, #tpu.memory_space<vmem>>, vector<128x128xf32>
    %c0_1 = arith.constant 0 : index
    %c0_2 = arith.constant 0 : index
    %1 = vector.load %arg1[%c0_1, %c0_2] : memref<128x128xf32, #tpu.memory_space<vmem>>, vector<128x128xf32>
    %cst = arith.constant dense<0.000000e+00> : vector<128x128xf32>
    %2 = tpu.matmul %0, %1, %cst {dimension_numbers = #tpu.dot_dimension_numbers<[1], [0], [0], [1], [0, 0, 1, 1], [], []>} : vector<128x128xf32>, vector<128x128xf32>, vector<128x128xf32> -> vector<128x128xf32>
    %cst_3 = arith.constant dense<0.000000e+00> : vector<128xf32>
    %3 = vector.multi_reduction <add>, %2, %cst_3 [0] : vector<128x128xf32> to vector<128xf32>
    %4 = vector.shape_cast %3 : vector<128xf32> to vector<1x128xf32>
    %cst_4 = arith.constant 1.280000e+02 : f32
    %5 = vector.broadcast %cst_4 : f32 to vector<1x128xf32>
    %6 = arith.divf %4, %5 : vector<1x128xf32>
    %7 = arith.mulf %2, %2 : vector<128x128xf32>
    %cst_5 = arith.constant dense<0.000000e+00> : vector<128xf32>
    %8 = vector.multi_reduction <add>, %7, %cst_5 [0] : vector<128x128xf32> to vector<128xf32>
    %9 = vector.shape_cast %8 : vector<128xf32> to vector<1x128xf32>
    %cst_6 = arith.constant 1.280000e+02 : f32
    %10 = vector.broadcast %cst_6 : f32 to vector<1x128xf32>
    %11 = arith.divf %9, %10 : vector<1x128xf32>
    %12 = tpu.concatenate %6, %11 in 0 : vector<1x128xf32>, vector<1x128xf32> -> vector<2x128xf32>
    %c0_7 = arith.constant 0 : index
    %c0_8 = arith.constant 0 : index
    %13 = vector.load %arg2[%c0_7, %c0_8] : memref<128x128xf32, #tpu.memory_space<vmem>>, vector<128x128xf32>
    %cst_9 = arith.constant dense<0.000000e+00> : vector<2x128xf32>
    %14 = tpu.matmul %12, %13, %cst_9 {dimension_numbers = #tpu.dot_dimension_numbers<[1], [0], [0], [1], [0, 0, 1, 1], [], []>} : vector<2x128xf32>, vector<128x128xf32>, vector<2x128xf32> -> vector<2x128xf32>
    %15 = vector.extract_strided_slice %14 {offsets = [0, 0], sizes = [1, 128], strides = [1, 1]} : vector<2x128xf32> to vector<1x128xf32>
    %16 = vector.extract_strided_slice %14 {offsets = [1, 0], sizes = [1, 128], strides = [1, 1]} : vector<2x128xf32> to vector<1x128xf32>
    %17 = arith.mulf %15, %15 : vector<1x128xf32>
    %18 = arith.subf %16, %17 : vector<1x128xf32>
    %cst_10 = arith.constant 0.000000e+00 : f32
    %19 = vector.broadcast %cst_10 : f32 to vector<1x128xf32>
    %20 = arith.maximumf %18, %19 : vector<1x128xf32>
    %c0_11 = arith.constant 0 : index
    %c0_12 = arith.constant 0 : index
    %21 = vector.load %arg6[%c0_11, %c0_12] : memref<4x128xf32, #tpu.memory_space<vmem>>, vector<1x128xf32>
    %c1 = arith.constant 1 : index
    %c0_13 = arith.constant 0 : index
    %22 = vector.load %arg6[%c1, %c0_13] : memref<4x128xf32, #tpu.memory_space<vmem>>, vector<1x128xf32>
    %23 = vector.broadcast %15 : vector<1x128xf32> to vector<128x128xf32>
    %24 = arith.subf %2, %23 : vector<128x128xf32>
    %cst_14 = arith.constant 9.99999974E-6 : f32
    %25 = vector.broadcast %cst_14 : f32 to vector<1x128xf32>
    %26 = arith.addf %20, %25 : vector<1x128xf32>
    %27 = math.rsqrt %26 : vector<1x128xf32>
    %28 = vector.broadcast %27 : vector<1x128xf32> to vector<128x128xf32>
    %29 = arith.mulf %24, %28 : vector<128x128xf32>
    %30 = vector.broadcast %21 : vector<1x128xf32> to vector<128x128xf32>
    %31 = arith.mulf %29, %30 : vector<128x128xf32>
    %32 = vector.broadcast %22 : vector<1x128xf32> to vector<128x128xf32>
    %33 = arith.addf %31, %32 : vector<128x128xf32>
    %cst_15 = arith.constant 0.000000e+00 : f32
    %34 = vector.broadcast %cst_15 : f32 to vector<128x128xf32>
    %35 = arith.maximumf %33, %34 : vector<128x128xf32>
    %c0_16 = arith.constant 0 : index
    %c0_17 = arith.constant 0 : index
    %36 = vector.load %arg3[%c0_16, %c0_17] : memref<128x128xf32, #tpu.memory_space<vmem>>, vector<128x128xf32>
    %cst_18 = arith.constant dense<0.000000e+00> : vector<128x128xf32>
    %37 = tpu.matmul %35, %36, %cst_18 {dimension_numbers = #tpu.dot_dimension_numbers<[1], [0], [0], [1], [0, 0, 1, 1], [], []>} : vector<128x128xf32>, vector<128x128xf32>, vector<128x128xf32> -> vector<128x128xf32>
    %cst_19 = arith.constant 0.000000e+00 : f32
    %38 = vector.broadcast %cst_19 : f32 to vector<128x128xf32>
    %39 = arith.subf %38, %37 : vector<128x128xf32>
    %40 = math.exp %39 : vector<128x128xf32>
    %cst_20 = arith.constant 1.000000e+00 : f32
    %41 = vector.broadcast %cst_20 : f32 to vector<128x128xf32>
    %42 = arith.addf %41, %40 : vector<128x128xf32>
    %cst_21 = arith.constant 1.000000e+00 : f32
    %43 = vector.broadcast %cst_21 : f32 to vector<128x128xf32>
    %44 = arith.divf %43, %42 : vector<128x128xf32>
    %45 = arith.mulf %35, %44 : vector<128x128xf32>
    %46 = vector.shape_cast %35 : vector<128x128xf32> to vector<2x64x128xf32>
    %cst_22 = arith.constant dense<0.000000e+00> : vector<2x128xf32>
    %47 = vector.multi_reduction <add>, %46, %cst_22 [1] : vector<2x64x128xf32> to vector<2x128xf32>
    %cst_23 = arith.constant 6.400000e+01 : f32
    %48 = vector.broadcast %cst_23 : f32 to vector<2x128xf32>
    %49 = arith.divf %47, %48 : vector<2x128xf32>
    %c0_24 = arith.constant 0 : index
    %c0_25 = arith.constant 0 : index
    %50 = vector.load %arg4[%c0_24, %c0_25] : memref<128x128xf32, #tpu.memory_space<vmem>>, vector<128x128xf32>
    %cst_26 = arith.constant dense<0.000000e+00> : vector<2x128xf32>
    %51 = tpu.matmul %49, %50, %cst_26 {dimension_numbers = #tpu.dot_dimension_numbers<[1], [0], [0], [1], [0, 0, 1, 1], [], []>} : vector<2x128xf32>, vector<128x128xf32>, vector<2x128xf32> -> vector<2x128xf32>
    %c2 = arith.constant 2 : index
    %c0_27 = arith.constant 0 : index
    %52 = vector.load %arg6[%c2, %c0_27] : memref<4x128xf32, #tpu.memory_space<vmem>>, vector<1x128xf32>
    %53 = vector.broadcast %52 : vector<1x128xf32> to vector<2x128xf32>
    %54 = arith.addf %51, %53 : vector<2x128xf32>
    %cst_28 = arith.constant 0.000000e+00 : f32
    %55 = vector.broadcast %cst_28 : f32 to vector<2x128xf32>
    %56 = arith.maximumf %54, %55 : vector<2x128xf32>
    %c0_29 = arith.constant 0 : index
    %c0_30 = arith.constant 0 : index
    %57 = vector.load %arg5[%c0_29, %c0_30] : memref<128x128xf32, #tpu.memory_space<vmem>>, vector<128x128xf32>
    %cst_31 = arith.constant dense<0.000000e+00> : vector<2x128xf32>
    %58 = tpu.matmul %56, %57, %cst_31 {dimension_numbers = #tpu.dot_dimension_numbers<[1], [0], [0], [1], [0, 0, 1, 1], [], []>} : vector<2x128xf32>, vector<128x128xf32>, vector<2x128xf32> -> vector<2x128xf32>
    %c3 = arith.constant 3 : index
    %c0_32 = arith.constant 0 : index
    %59 = vector.load %arg6[%c3, %c0_32] : memref<4x128xf32, #tpu.memory_space<vmem>>, vector<1x128xf32>
    %60 = vector.broadcast %59 : vector<1x128xf32> to vector<2x128xf32>
    %61 = arith.addf %58, %60 : vector<2x128xf32>
    %cst_33 = arith.constant 0.000000e+00 : f32
    %62 = vector.broadcast %cst_33 : f32 to vector<2x128xf32>
    %63 = arith.subf %62, %61 : vector<2x128xf32>
    %64 = math.exp %63 : vector<2x128xf32>
    %cst_34 = arith.constant 1.000000e+00 : f32
    %65 = vector.broadcast %cst_34 : f32 to vector<2x128xf32>
    %66 = arith.addf %65, %64 : vector<2x128xf32>
    %cst_35 = arith.constant 1.000000e+00 : f32
    %67 = vector.broadcast %cst_35 : f32 to vector<2x128xf32>
    %68 = arith.divf %67, %66 : vector<2x128xf32>
    %69 = vector.shape_cast %68 : vector<2x128xf32> to vector<2x1x128xf32>
    %70 = vector.broadcast %69 : vector<2x1x128xf32> to vector<2x64x128xf32>
    %71 = arith.mulf %46, %70 : vector<2x64x128xf32>
    %72 = vector.shape_cast %71 : vector<2x64x128xf32> to vector<128x128xf32>
    %73 = arith.addf %45, %72 : vector<128x128xf32>
    %c0_36 = arith.constant 0 : index
    %c0_37 = arith.constant 0 : index
    %74 = vector.load %arg7[%c0_36, %c0_37] : memref<128x128xf32, #tpu.memory_space<vmem>>, vector<128x128xf32>
    tpu.vector_store %arg7[%c0_36, %c0_37], %73 {strides = array<i32>} : memref<128x128xf32, #tpu.memory_space<vmem>>, vector<128x128xf32>,
    return
  }
}

</mosaic_0001>

<bundles_post_ra>
// kernel: tpu_custom_call.1
= control target key start
LH: loop header
LB: loop body
LE: loop exit
PB: predicated region body
PF: predicated region fallthrough
CT: control target
= control target key end

     0   :  { %12 = vsyncpa [#allocation3], 0  ;;  %s2355_s0 = inlined_call_operand.hbm [shape: f32[128,128], index: 0, kind: input, shape index: {}]   ;;  %s2356_s1 = inlined_call_operand.hbm [shape: f32[128,128], index: 1, kind: input, shape index: {}]   ;;  %s2357_s2 = inlined_call_operand.hbm [shape: f32[128,128], index: 2, kind: input, shape index: {}]   ;;  %s2358_s3 = inlined_call_operand.hbm [shape: f32[128,128], index: 3, kind: input, shape index: {}]   ;;  %s2359_s4 = inlined_call_operand.hbm [shape: f32[128,128], index: 4, kind: input, shape index: {}]   ;;  %s2360_s5 = inlined_call_operand.hbm [shape: f32[128,128], index: 5, kind: input, shape index: {}]   ;;  %s2361_s6 = inlined_call_operand.vmem [shape: f32[4,128], index: 6, kind: input, shape index: {}]   ;;  %s2362_s7 = inlined_call_operand.hbm [shape: f32[128,128], index: 7, kind: output, shape index: {}]  }
   0x1   :  { %13 = vsyncpa [#allocation6], 0 }
   0x2   :  { %14 = vsyncpa [#allocation9], 0 }
   0x3   :  { %15 = vsyncpa [#allocation12], 0 }
   0x4   :  { %16 = vsyncpa [#allocation4], 0  ;;  %s1857_s24 = smov [#allocation5]   ;;  %s1858_s26 = smov [#allocation8]  }
   0x5   :  { %s34_s25 = sshll.u32 %s1857_s24, 4  ;;  %s58_s27 = sshll.u32 %s1858_s26, 4  ;;  %s35_s25 = int_to_ptr.vmem [resolvable:$true] %s34_s25  ;;  %s1910_s27 = int_to_ptr.vmem [resolvable:$true] %s58_s27 }
   0x6   :  { %s1693_s30 = scalar_lea.hbm %s2356_s1, 2048 }
   0x7   :  { %p1694_p0 = scmp.ne.s32.totalorder %s2356_s1, %s1693_s30  ;;  %p1697_p1 = scmp.lt.u32.totalorder %s1693_s30, %s2356_s1 }
   0x9   :  { %p1699_p2 = pnand %p1697_p1, %p1694_p0 }
   0xb   :  { %1702 = shalt.err (!%p1699_p2)
}
   0xc   :  { %s1703_s12 = scalar_lea.vmem %s35_s25, 2048  ;;  %p1708_p4 = scmp.lt.s32.totalorder %s35_s25, %s35_s25 }
   0xd   :  { %p1704_p3 = scmp.ne.s32.totalorder %s35_s25, %s1703_s12  ;;  %p1709_p5 = scmp.lt.s32.totalorder %s1703_s12, %s1703_s12 }
   0xf   :  { %p1710_p6 = por %p1709_p5, %p1708_p4 }
  0x11   :  { %p1711_p7 = pnand %p1710_p6, %p1704_p3 }
  0x13   :  { %1714 = shalt.err (!%p1711_p7)
}
  0x14   :  { %s1859_s13 = smov 128   ;;  %s1860_s14 = smov 8  }
  0x15   :  { %40 = dma.hbm_to_vmem [thread:$0]  %s2356_s1, 2048, %s35_s25, [#allocation6], %s1859_s13, %s1859_s13, %s1860_s14  }
  0x16   :  { %s1715_s19 = scalar_lea.hbm %s2358_s3, 2048 }
  0x17   :  { %p1716_p8 = scmp.ne.s32.totalorder %s2358_s3, %s1715_s19  ;;  %p1719_p9 = scmp.lt.u32.totalorder %s1715_s19, %s2358_s3 }
  0x19   :  { %p1721_p10 = pnand %p1719_p9, %p1716_p8 }
  0x1b   :  { %1724 = shalt.err (!%p1721_p10)
}
  0x1c   :  { %s1725_s24 = scalar_lea.vmem %s1910_s27, 2048  ;;  %p1730_p12 = scmp.lt.s32.totalorder %s1910_s27, %s1910_s27 }
  0x1d   :  { %p1726_p11 = scmp.ne.s32.totalorder %s1910_s27, %s1725_s24  ;;  %p1731_p13 = scmp.lt.s32.totalorder %s1725_s24, %s1725_s24 }
  0x1f   :  { %p1732_p0 = por %p1731_p13, %p1730_p12 }
  0x21   :  { %p1733_p1 = pnand %p1732_p0, %p1726_p11 }
  0x23   :  { %1736 = shalt.err (!%p1733_p1)
}
  0x24   :  { %64 = dma.hbm_to_vmem [thread:$0]  %s2358_s3, 2048, %s1910_s27, [#allocation9], %s1859_s13, %s1859_s13, %s1860_s14  }
  0x25   :  { %s1861_s26 = smov [#allocation2]   ;;  %s1862_s29 = smov [#allocation7]  }
  0x26   :  { %s22_s28 = sshll.u32 %s1861_s26, 4  ;;  %s46_s30 = sshll.u32 %s1862_s29, 4  ;;  %s23_s28 = int_to_ptr.vmem [resolvable:$true] %s22_s28  ;;  %s1947_s30 = int_to_ptr.vmem [resolvable:$true] %s46_s30 }
  0x27   :  { %s1737_s10 = scalar_lea.hbm %s2355_s0, 2048 }
  0x28   :  { %p1738_p2 = scmp.ne.s32.totalorder %s2355_s0, %s1737_s10  ;;  %p1741_p3 = scmp.lt.u32.totalorder %s1737_s10, %s2355_s0 }
  0x2a   :  { %p1743_p4 = pnand %p1741_p3, %p1738_p2 }
  0x2c   :  { %1746 = shalt.err (!%p1743_p4)
}
  0x2d   :  { %s1747_s3 = scalar_lea.vmem %s23_s28, 2048  ;;  %p1752_p6 = scmp.lt.s32.totalorder %s23_s28, %s23_s28 }
  0x2e   :  { %p1748_p5 = scmp.ne.s32.totalorder %s23_s28, %s1747_s3  ;;  %p1753_p7 = scmp.lt.s32.totalorder %s1747_s3, %s1747_s3 }
  0x30   :  { %p1754_p8 = por %p1753_p7, %p1752_p6 }
  0x32   :  { %p1755_p9 = pnand %p1754_p8, %p1748_p5 }
  0x34   :  { %1758 = shalt.err (!%p1755_p9)
}
  0x35   :  { %28 = dma.hbm_to_vmem [thread:$0]  %s2355_s0, 2048, %s23_s28, [#allocation3], %s1859_s13, %s1859_s13, %s1860_s14  }
  0x36   :  { %s1759_s20 = scalar_lea.hbm %s2357_s2, 2048 }
  0x37   :  { %p1760_p10 = scmp.ne.s32.totalorder %s2357_s2, %s1759_s20  ;;  %p1763_p11 = scmp.lt.u32.totalorder %s1759_s20, %s2357_s2 }
  0x39   :  { %p1765_p12 = pnand %p1763_p11, %p1760_p10 }
  0x3b   :  { %1768 = shalt.err (!%p1765_p12)
}
  0x3c   :  { %s1769_s1 = scalar_lea.vmem %s1947_s30, 2048  ;;  %p1774_p0 = scmp.lt.s32.totalorder %s1947_s30, %s1947_s30 }
  0x3d   :  { %p1770_p13 = scmp.ne.s32.totalorder %s1947_s30, %s1769_s1  ;;  %p1775_p1 = scmp.lt.s32.totalorder %s1769_s1, %s1769_s1 }
  0x3f   :  { %p1776_p2 = por %p1775_p1, %p1774_p0 }
  0x41   :  { %p1777_p3 = pnand %p1776_p2, %p1770_p13 }
  0x43   :  { %1780 = shalt.err (!%p1777_p3)
}
  0x44   :  { %52 = dma.hbm_to_vmem [thread:$0]  %s2357_s2, 2048, %s1947_s30, [#allocation6], %s1859_s13, %s1859_s13, %s1860_s14  }
  0x45   :  { %s1863_s26 = smov [#allocation10]   ;;  %s1864_s29 = smov [#allocation11]  }
  0x46   :  { %s70_s28 = sshll.u32 %s1863_s26, 4  ;;  %s82_s8 = sshll.u32 %s1864_s29, 4  ;;  %s71_s28 = int_to_ptr.vmem [resolvable:$true] %s70_s28  ;;  %s1984_s8 = int_to_ptr.vmem [resolvable:$true] %s82_s8 }
  0x47   :  { %s1781_s11 = scalar_lea.hbm %s2359_s4, 2048 }
  0x48   :  { %p1782_p4 = scmp.ne.s32.totalorder %s2359_s4, %s1781_s11  ;;  %p1785_p5 = scmp.lt.u32.totalorder %s1781_s11, %s2359_s4 }
  0x4a   :  { %p1787_p6 = pnand %p1785_p5, %p1782_p4 }
  0x4c   :  { %1790 = shalt.err (!%p1787_p6)
}
  0x4d   :  { %s1791_s2 = scalar_lea.vmem %s71_s28, 2048  ;;  %p1796_p8 = scmp.lt.s32.totalorder %s71_s28, %s71_s28 }
  0x4e   :  { %p1792_p7 = scmp.ne.s32.totalorder %s71_s28, %s1791_s2  ;;  %p1797_p9 = scmp.lt.s32.totalorder %s1791_s2, %s1791_s2 }
  0x50   :  { %p1798_p10 = por %p1797_p9, %p1796_p8 }
  0x52   :  { %p1799_p11 = pnand %p1798_p10, %p1792_p7 }
  0x54   :  { %1802 = shalt.err (!%p1799_p11)
}
  0x55   :  { %76 = dma.hbm_to_vmem [thread:$0]  %s2359_s4, 2048, %s71_s28, [#allocation9], %s1859_s13, %s1859_s13, %s1860_s14  }
  0x56   :  { %s1803_s19 = scalar_lea.hbm %s2360_s5, 2048 }
  0x57   :  { %p1804_p12 = scmp.ne.s32.totalorder %s2360_s5, %s1803_s19  ;;  %p1807_p13 = scmp.lt.u32.totalorder %s1803_s19, %s2360_s5 }
  0x59   :  { %p1809_p0 = pnand %p1807_p13, %p1804_p12 }
  0x5b   :  { %1812 = shalt.err (!%p1809_p0)
}
  0x5c   :  { %s1813_s24 = scalar_lea.vmem %s1984_s8, 2048  ;;  %p1818_p2 = scmp.lt.s32.totalorder %s1984_s8, %s1984_s8 }
  0x5d   :  { %p1814_p1 = scmp.ne.s32.totalorder %s1984_s8, %s1813_s24  ;;  %p1819_p3 = scmp.lt.s32.totalorder %s1813_s24, %s1813_s24 }
  0x5f   :  { %p1820_p4 = por %p1819_p3, %p1818_p2 }
  0x61   :  { %p1821_p5 = pnand %p1820_p4, %p1814_p1 }
  0x63   :  { %1824 = shalt.err (!%p1821_p5)
}
  0x64   :  { %88 = dma.hbm_to_vmem [thread:$0]  %s2360_s5, 2048, %s1984_s8, [#allocation12], %s1859_s13, %s1859_s13, %s1860_s14  }
  0x65   :  { %1847 = dma.done.wait [#allocation3], 2048  }
  0x66   :  { %1848 = vsyncadd [#allocation3], 4294965248 }
  0x67   :  { %1849 = dma.done.wait [#allocation6], 4096  }
  0x68   :  { %1850 = vsyncadd [#allocation6], 4294963200 }
  0x69   :  { %1851 = dma.done.wait [#allocation9], 4096  }
  0x6a   :  { %1852 = vsyncadd [#allocation9], 4294963200 }
  0x6b   :  { %1853 = dma.done.wait [#allocation12], 2048  }
  0x6c   :  { %1854 = vsyncadd [#allocation12], 4294965248  ;;  %v125_v0 = vld [vmem:[#allocation5] sm:$0xff]  ;;  %v126_v1 = vld [vmem:[#allocation5 + $0x8] sm:$0xff]  ;;  %v1865_v43 = vmov 0.0|0.0   ;;  %vm1866_vm0 = vmmov 0  }
  0x6d   :  { %v127_v2 = vld [vmem:[#allocation5 + $0x10] sm:$0xff]  ;;  %v1474_v3 = vpack.c.bf16 %v126_v1, %v125_v0  ;;  %v128_v4 = vld [vmem:[#allocation5 + $0x18] sm:$0xff]  ;;  %v129_v6 = vld [vmem:[#allocation5 + $0x20] sm:$0xff]  ;;  %1506 = vmatprep.subr.bf16.mxu1 %v1865_v43  ;;  %v1867_v61 = vmov 0.0   ;;  %vm347_vm1 = vcmask 1040384   ;;  %vm866_vm2 = vcmask 1041409  }
  0x6e   :  { %v1478_v5 = vpack.c.bf16 %v128_v4, %v127_v2  ;;  %v130_v7 = vld [vmem:[#allocation5 + $0x28] sm:$0xff]  ;;  %v109_v9 = vld [vmem:[#allocation2] sm:$0xff]  ;;  %v131_v10 = vld [vmem:[#allocation5 + $0x30] sm:$0xff]  ;;  %1345 = vmatprep.mubr.msk.f32.mxu1 %vm1866_vm0, %v1867_v61 }
  0x6f   :  { %1475 = vmatprep.subr.bf16.mxu0 %v1474_v3  ;;  %v1482_v8 = vpack.c.bf16 %v130_v7, %v129_v6  ;;  %v132_v11 = vld [vmem:[#allocation5 + $0x38] sm:$0xff]  ;;  %1289 = vmatprep.mubr.f32.mxu0 %v109_v9  ;;  %v133_v13 = vld [vmem:[#allocation5 + $0x40] sm:$0xff]  ;;  %v134_v14 = vld [vmem:[#allocation5 + $0x48] sm:$0xff] }
  0x70   :  { %1477 = vmatpush3.bf16.msra.mxu0 %v1474_v3  ;;  %v1486_v12 = vpack.c.bf16 %v132_v11, %v131_v10  ;;  %v1490_v15 = vpack.c.bf16 %v134_v14, %v133_v13  ;;  %v135_v16 = vld [vmem:[#allocation5 + $0x50] sm:$0xff]  ;;  %v136_v17 = vld [vmem:[#allocation5 + $0x58] sm:$0xff]  ;;  %v137_v19 = vld [vmem:[#allocation5 + $0x60] sm:$0xff] }
  0x71   :  { %1479 = vmatprep.subr.bf16.mxu0 %v1478_v5  ;;  %v1494_v18 = vpack.c.bf16 %v136_v17, %v135_v16  ;;  %v138_v20 = vld [vmem:[#allocation5 + $0x68] sm:$0xff]  ;;  %v139_v22 = vld [vmem:[#allocation5 + $0x70] sm:$0xff]  ;;  %v140_v23 = vld [vmem:[#allocation5 + $0x78] sm:$0xff] }
  0x72   :  { %v1498_v21 = vpack.c.bf16 %v138_v20, %v137_v19  ;;  %v1502_v24 = vpack.c.bf16 %v140_v23, %v139_v22  ;;  %v110_v25 = vld [vmem:[#allocation2 + $0x8] sm:$0xff]  ;;  %v111_v26 = vld [vmem:[#allocation2 + $0x10] sm:$0xff]  ;;  %v112_v27 = vld [vmem:[#allocation2 + $0x18] sm:$0xff] }
  0x73   :  { %v113_v28 = vld [vmem:[#allocation2 + $0x20] sm:$0xff]  ;;  %v114_v29 = vld [vmem:[#allocation2 + $0x28] sm:$0xff]  ;;  %v115_v30 = vld [vmem:[#allocation2 + $0x30] sm:$0xff] }
  0x74   :  { %1481 = vmatpush3.bf16.msra.mxu0 %v1478_v5  ;;  %v116_v31 = vld [vmem:[#allocation2 + $0x38] sm:$0xff]  ;;  %v117_v32 = vld [vmem:[#allocation2 + $0x40] sm:$0xff]  ;;  %v118_v33 = vld [vmem:[#allocation2 + $0x48] sm:$0xff] }
  0x75   :  { %1483 = vmatprep.subr.bf16.mxu0 %v1482_v8  ;;  %v119_v34 = vld [vmem:[#allocation2 + $0x50] sm:$0xff]  ;;  %v120_v35 = vld [vmem:[#allocation2 + $0x58] sm:$0xff]  ;;  %v121_v36 = vld [vmem:[#allocation2 + $0x60] sm:$0xff] }
  0x76   :  { %v122_v37 = vld [vmem:[#allocation2 + $0x68] sm:$0xff]  ;;  %v123_v38 = vld [vmem:[#allocation2 + $0x70] sm:$0xff]  ;;  %v124_v39 = vld [vmem:[#allocation2 + $0x78] sm:$0xff] }
  0x77   :  { %v349_v40 = vld [vmem:[#allocation7] sm:$0xff]  ;;  %v350_v41 = vld [vmem:[#allocation7 + $0x8] sm:$0xff]  ;;  %v351_v44 = vld [vmem:[#allocation7 + $0x10] sm:$0xff] }
  0x78   :  { %1485 = vmatpush3.bf16.msra.mxu0 %v1482_v8  ;;  %v1507_v42 = vpack.c.bf16 %v350_v41, %v349_v40  ;;  %v352_v45 = vld [vmem:[#allocation7 + $0x18] sm:$0xff]  ;;  %v353_v47 = vld [vmem:[#allocation7 + $0x20] sm:$0xff]  ;;  %v354_v48 = vld [vmem:[#allocation7 + $0x28] sm:$0xff] }
  0x79   :  { %1487 = vmatprep.subr.bf16.mxu0 %v1486_v12  ;;  %v1510_v46 = vpack.c.bf16 %v352_v45, %v351_v44  ;;  %v1513_v49 = vpack.c.bf16 %v354_v48, %v353_v47  ;;  %v355_v50 = vld [vmem:[#allocation7 + $0x30] sm:$0xff]  ;;  %v356_v51 = vld [vmem:[#allocation7 + $0x38] sm:$0xff]  ;;  %v357_v53 = vld [vmem:[#allocation7 + $0x40] sm:$0xff] }
  0x7a   :  { %1508 = vmatpush3.bf16.msra.mxu1 %v1507_v42  ;;  %v1516_v52 = vpack.c.bf16 %v356_v51, %v355_v50  ;;  %v358_v54 = vld [vmem:[#allocation7 + $0x48] sm:$0xff]  ;;  %v359_v56 = vld [vmem:[#allocation7 + $0x50] sm:$0xff]  ;;  %v360_v57 = vld [vmem:[#allocation7 + $0x58] sm:$0xff] }
  0x7b   :  { %1509 = vmatprep.subr.bf16.mxu1 %v1865_v43  ;;  %v1519_v55 = vpack.c.bf16 %v358_v54, %v357_v53  ;;  %v1522_v58 = vpack.c.bf16 %v360_v57, %v359_v56  ;;  %v361_v59 = vld [vmem:[#allocation7 + $0x60] sm:$0xff]  ;;  %v362_v60 = vld [vmem:[#allocation7 + $0x68] sm:$0xff]  ;;  %v363_v63 = vld [vmem:[#allocation7 + $0x70] sm:$0xff] }
  0x7c   :  { %1489 = vmatpush3.bf16.msra.mxu0 %v1486_v12  ;;  %v1525_v62 = vpack.c.bf16 %v362_v60, %v361_v59  ;;  %v364_v0 = vld [vmem:[#allocation7 + $0x78] sm:$0xff] }
  0x7d   :  { %1491 = vmatprep.subr.bf16.mxu0 %v1490_v15  ;;  %v1528_v1 = vpack.c.bf16 %v364_v0, %v363_v63 }
  0x7e   :  { %1511 = vmatpush3.bf16.msra.mxu1 %v1510_v46 }
  0x7f   :  { %1512 = vmatprep.subr.bf16.mxu1 %v1865_v43 }
  0x80   :  { %1493 = vmatpush3.bf16.msra.mxu0 %v1490_v15 }
  0x81   :  { %1495 = vmatprep.subr.bf16.mxu0 %v1494_v18 }
  0x82   :  { %1514 = vmatpush3.bf16.msra.mxu1 %v1513_v49 }
  0x83   :  { %1515 = vmatprep.subr.bf16.mxu1 %v1865_v43 }
  0x84   :  { %1497 = vmatpush3.bf16.msra.mxu0 %v1494_v18 }
  0x85   :  { %1499 = vmatprep.subr.bf16.mxu0 %v1498_v21 }
  0x86   :  { %1517 = vmatpush3.bf16.msra.mxu1 %v1516_v52 }
  0x87   :  { %1518 = vmatprep.subr.bf16.mxu1 %v1865_v43 }
  0x88   :  { %1501 = vmatpush3.bf16.msra.mxu0 %v1498_v21 }
  0x89   :  { %1503 = vmatprep.subr.bf16.mxu0 %v1502_v24 }
  0x8a   :  { %1520 = vmatpush3.bf16.msra.mxu1 %v1519_v55 }
  0x8b   :  { %1521 = vmatprep.subr.bf16.mxu1 %v1865_v43 }
  0x8c   :  { %1505 = vmatpush3.bf16.msra.mxu0 %v1502_v24 }
  0x8e   :  { %1523 = vmatpush3.bf16.msra.mxu1 %v1522_v58 }
  0x8f   :  { %1290 = vmatmul.mubr.f32.vlgmr.msra.gmra.mrb[0].mxu0 %v110_v25  ;;  %1524 = vmatprep.subr.bf16.mxu1 %v1865_v43 }
  0x90   :  { %1292 = vmatprep.mubr.f32.mxu0 %v111_v26 }
  0x92   :  { %1526 = vmatpush3.bf16.msra.mxu1 %v1525_v62 }
  0x93   :  { %1293 = vmatmul.mubr.f32.gmra.mrb[2].mxu0 %v112_v27  ;;  %1527 = vmatprep.subr.bf16.mxu1 %v1865_v43 }
  0x94   :  { %1295 = vmatprep.mubr.f32.mxu0 %v113_v28 }
  0x96   :  { %1529 = vmatpush3.bf16.msra.mxu1 %v1528_v1 }
  0x97   :  { %1296 = vmatmul.mubr.f32.gmra.mrb[4].mxu0 %v114_v29  ;;  %1562 = vmatprep.subr.bf16.mxu1 %v1865_v43 }
  0x98   :  { %1298 = vmatprep.mubr.f32.mxu0 %v115_v30 }
  0x9b   :  { %1299 = vmatmul.mubr.f32.gmra.mrb[6].mxu0 %v116_v31 }
  0x9c   :  { %1301 = vmatprep.mubr.f32.mxu0 %v117_v32 }
  0x9f   :  { %1302 = vmatmul.mubr.f32.gmra.mrb[8].mxu0 %v118_v33 }
  0xa0   :  { %1304 = vmatprep.mubr.f32.mxu0 %v119_v34 }
  0xa3   :  { %1305 = vmatmul.mubr.f32.gmra.mrb[10].mxu0 %v120_v35 }
  0xa4   :  { %1307 = vmatprep.mubr.f32.mxu0 %v121_v36 }
  0xa7   :  { %1308 = vmatmul.mubr.f32.gmra.mrb[12].mxu0 %v122_v37 }
  0xa8   :  { %1310 = vmatprep.mubr.f32.mxu0 %v123_v38 }
  0xab   :  { %1311 = vmatmul.mubr.f32.gmra.mrb[14].mxu0 %v124_v39 }
 0x162   :  { %v2032_v2 = vpop.f32.mrb[0].mxu0 }
 0x163   :  { %v310_v3 = vmul.f32 %v2032_v2, %v2032_v2  ;;  %v2036_v4 = vpop.f32.mrb[1].mxu0 }
 0x164   :  { %v286_v5 = vadd.f32 %v2032_v2, %v2036_v4  ;;  %v309_v6 = vmul.f32 %v2036_v4, %v2036_v4 }
 0x166   :  { %v325_v7 = vadd.f32 %v310_v3, %v309_v6  ;;  %v2042_v8 = vpop.f32.mrb[2].mxu0 }
 0x167   :  { %v2044_v9 = vpop.f32.mrb[3].mxu0  ;;  %v312_v12 = vmul.f32 %v2042_v8, %v2042_v8 }
 0x168   :  { %v287_v10 = vadd.f32 %v286_v5, %v2044_v9  ;;  %v311_v11 = vmul.f32 %v2044_v9, %v2044_v9 }
 0x16a   :  { %v326_v13 = vadd.f32 %v325_v7, %v311_v11  ;;  %v2051_v14 = vpop.f32.mrb[4].mxu0  ;;  %v288_v15 = vadd.f32 %v2042_v8, %v287_v10 }
 0x16b   :  { %v2054_v16 = vpop.f32.mrb[5].mxu0  ;;  %v314_v20 = vmul.f32 %v2051_v14, %v2051_v14 }
 0x16c   :  { %v289_v17 = vadd.f32 %v288_v15, %v2054_v16  ;;  %v313_v18 = vmul.f32 %v2054_v16, %v2054_v16  ;;  %v327_v19 = vadd.f32 %v326_v13, %v312_v12 }
 0x16e   :  { %v328_v21 = vadd.f32 %v327_v19, %v313_v18  ;;  %v2061_v22 = vpop.f32.mrb[6].mxu0  ;;  %v290_v23 = vadd.f32 %v2051_v14, %v289_v17 }
 0x16f   :  { %v2064_v24 = vpop.f32.mrb[7].mxu0  ;;  %v316_v28 = vmul.f32 %v2061_v22, %v2061_v22 }
 0x170   :  { %v291_v25 = vadd.f32 %v290_v23, %v2064_v24  ;;  %v315_v26 = vmul.f32 %v2064_v24, %v2064_v24  ;;  %v329_v27 = vadd.f32 %v328_v21, %v314_v20 }
 0x172   :  { %v330_v29 = vadd.f32 %v329_v27, %v315_v26  ;;  %v2071_v30 = vpop.f32.mrb[8].mxu0  ;;  %v292_v31 = vadd.f32 %v2061_v22, %v291_v25  ;;  %v541_v25 = vld [vmem:[#allocation8] sm:$0xff]  ;;  %v542_v26 = vld [vmem:[#allocation8 + $0x8] sm:$0xff] }
 0x173   :  { %v2074_v32 = vpop.f32.mrb[9].mxu0  ;;  %v318_v36 = vmul.f32 %v2071_v30, %v2071_v30  ;;  %v1530_v27 = vpack.c.bf16 %v542_v26, %v541_v25  ;;  %v858_v25 = vld [vmem:[#allocation10 + $0x78] sm:$0xff] }
 0x174   :  { %v293_v33 = vadd.f32 %v292_v31, %v2074_v32  ;;  %v317_v34 = vmul.f32 %v2074_v32, %v2074_v32  ;;  %v331_v35 = vadd.f32 %v330_v29, %v316_v28  ;;  %v543_v28 = vld [vmem:[#allocation8 + $0x10] sm:$0xff]  ;;  %v544_v29 = vld [vmem:[#allocation8 + $0x18] sm:$0xff] }
 0x175   :  { %1531 = vmatprep.subr.bf16.mxu0 %v1530_v27  ;;  %v1534_v31 = vpack.c.bf16 %v544_v29, %v543_v28 }
 0x176   :  { %v332_v37 = vadd.f32 %v331_v35, %v317_v34  ;;  %v2081_v38 = vpop.f32.mrb[10].mxu0  ;;  %v294_v39 = vadd.f32 %v2071_v30, %v293_v33  ;;  %1533 = vmatpush3.bf16.msra.mxu0 %v1530_v27  ;;  %v545_v33 = vld [vmem:[#allocation8 + $0x20] sm:$0xff]  ;;  %v546_v34 = vld [vmem:[#allocation8 + $0x28] sm:$0xff]  ;;  %v443_v27 = vlaneseq }
 0x177   :  { %v2084_v40 = vpop.f32.mrb[11].mxu0  ;;  %v320_v45 = vmul.f32 %v2081_v38, %v2081_v38  ;;  %1535 = vmatprep.subr.bf16.mxu0 %v1534_v31  ;;  %v1538_v35 = vpack.c.bf16 %v546_v34, %v545_v33 }
 0x178   :  { %v295_v41 = vadd.f32 %v294_v39, %v2084_v40  ;;  %v319_v42 = vmul.f32 %v2084_v40, %v2084_v40  ;;  %v333_v44 = vadd.f32 %v332_v37, %v318_v36  ;;  %v547_v36 = vld [vmem:[#allocation8 + $0x30] sm:$0xff]  ;;  %v548_v37 = vld [vmem:[#allocation8 + $0x38] sm:$0xff]  ;;  %v2122_v28 = vshrl.u32 %v443_v27, 7 }
 0x179   :  { %v1542_v39 = vpack.c.bf16 %v548_v37, %v547_v36 }
 0x17a   :  { %v334_v46 = vadd.f32 %v333_v44, %v319_v42  ;;  %v2091_v47 = vpop.f32.mrb[12].mxu0  ;;  %v296_v48 = vadd.f32 %v2081_v38, %v295_v41  ;;  %1537 = vmatpush3.bf16.msra.mxu0 %v1534_v31  ;;  %v549_v41 = vld [vmem:[#allocation8 + $0x40] sm:$0xff]  ;;  %v550_v42 = vld [vmem:[#allocation8 + $0x48] sm:$0xff]  ;;  %v2125_v29 = vsub.s32 0, %v2122_v28 }
 0x17b   :  { %v2094_v49 = vpop.f32.mrb[13].mxu0  ;;  %v322_v53 = vmul.f32 %v2091_v47, %v2091_v47  ;;  %1539 = vmatprep.subr.bf16.mxu0 %v1538_v35  ;;  %v1546_v44 = vpack.c.bf16 %v550_v42, %v549_v41 }
 0x17c   :  { %v297_v50 = vadd.f32 %v296_v48, %v2094_v49  ;;  %v321_v51 = vmul.f32 %v2094_v49, %v2094_v49  ;;  %v335_v52 = vadd.f32 %v334_v46, %v320_v45  ;;  %v551_v45 = vld [vmem:[#allocation8 + $0x50] sm:$0xff]  ;;  %v552_v46 = vld [vmem:[#allocation8 + $0x58] sm:$0xff] }
 0x17d   :  { %v1550_v48 = vpack.c.bf16 %v552_v46, %v551_v45 }
 0x17e   :  { %v336_v54 = vadd.f32 %v335_v52, %v321_v51  ;;  %v2101_v55 = vpop.f32.mrb[14].mxu0  ;;  %v298_v56 = vadd.f32 %v2091_v47, %v297_v50  ;;  %1541 = vmatpush3.bf16.msra.mxu0 %v1538_v35  ;;  %v553_v50 = vld [vmem:[#allocation8 + $0x60] sm:$0xff]  ;;  %v554_v51 = vld [vmem:[#allocation8 + $0x68] sm:$0xff]  ;;  %v555_v52 = vld [vmem:[#allocation8 + $0x70] sm:$0xff] }
 0x17f   :  { %v2104_v57 = vpop.f32.mrb[15].mxu0  ;;  %v324_v62 = vmul.f32 %v2101_v55, %v2101_v55  ;;  %1543 = vmatprep.subr.bf16.mxu0 %v1542_v39 }
 0x180   :  { %v299_v58 = vadd.f32 %v298_v56, %v2104_v57  ;;  %v323_v59 = vmul.f32 %v2104_v57, %v2104_v57  ;;  %v337_v60 = vadd.f32 %v336_v54, %v322_v53  ;;  %v1554_v53 = vpack.c.bf16 %v554_v51, %v553_v50  ;;  %v556_v54 = vld [vmem:[#allocation8 + $0x78] sm:$0xff]  ;;  %v843_v56 = vld [vmem:[#allocation10] sm:$0xff] }
 0x182   :  { %v300_v63 = vadd.f32 %v2101_v55, %v299_v58  ;;  %v338_v0 = vadd.f32 %v337_v60, %v323_v59  ;;  %1545 = vmatpush3.bf16.msra.mxu0 %v1542_v39  ;;  %v844_v58 = vld [vmem:[#allocation10 + $0x8] sm:$0xff]  ;;  %v1558_v59 = vpack.c.bf16 %v556_v54, %v555_v52  ;;  %v2177_v54 = vld [vmem:[%s2361_s6 + $0x1] ss:$0 sm:$0xff] }
 0x183   :  { %1547 = vmatprep.subr.bf16.mxu0 %v1546_v44  ;;  %v1563_v60 = vpack.c.bf16 %v844_v58, %v843_v56 }
 0x184   :  { %v301_v1 = vrot.slane %v300_v63, 4  ;;  %v339_v3 = vadd.f32 %v338_v0, %v324_v62  ;;  %v845_v62 = vld [vmem:[#allocation10 + $0x10] sm:$0xff] }
 0x186   :  { %v302_v5 = vadd.f32 %v301_v1, %v300_v63  ;;  %v340_v6 = vrot.slane %v339_v3, 4  ;;  %1549 = vmatpush3.bf16.msra.mxu0 %v1546_v44  ;;  %v846_v63 = vld [vmem:[#allocation10 + $0x18] sm:$0xff]  ;;  %v847_v1 = vld [vmem:[#allocation10 + $0x20] sm:$0xff] }
 0x187   :  { %1551 = vmatprep.subr.bf16.mxu0 %v1550_v48  ;;  %v1566_v0 = vpack.c.bf16 %v846_v63, %v845_v62 }
 0x188   :  { %v303_v7 = vrot.slane %v302_v5, 2  ;;  %v341_v10 = vadd.f32 %v340_v6, %v339_v3  ;;  %v848_v3 = vld [vmem:[#allocation10 + $0x28] sm:$0xff]  ;;  %v849_v6 = vld [vmem:[#allocation10 + $0x30] sm:$0xff] }
 0x18a   :  { %v304_v11 = vadd.f32 %v303_v7, %v302_v5  ;;  %v342_v12 = vrot.slane %v341_v10, 2  ;;  %1553 = vmatpush3.bf16.msra.mxu0 %v1550_v48  ;;  %v1569_v5 = vpack.c.bf16 %v848_v3, %v847_v1  ;;  %v850_v7 = vld [vmem:[#allocation10 + $0x38] sm:$0xff] }
 0x18b   :  { %1555 = vmatprep.subr.bf16.mxu0 %v1554_v53 }
 0x18c   :  { %v305_v13 = vrot.slane %v304_v11, 1  ;;  %v343_v15 = vadd.f32 %v342_v12, %v341_v10  ;;  %v1572_v10 = vpack.c.bf16 %v850_v7, %v849_v6  ;;  %v852_v12 = vld [vmem:[#allocation10 + $0x48] sm:$0xff] }
 0x18e   :  { %v306_v17 = vadd.f32 %v305_v13, %v304_v11  ;;  %v344_v18 = vrot.slane %v343_v15, 1  ;;  %1557 = vmatpush3.bf16.msra.mxu0 %v1554_v53  ;;  %v851_v11 = vld [vmem:[#allocation10 + $0x40] sm:$0xff] }
 0x18f   :  { %1559 = vmatprep.subr.bf16.mxu0 %v1558_v59  ;;  %v1575_v13 = vpack.c.bf16 %v852_v12, %v851_v11 }
 0x190   :  { %v345_v19 = vadd.f32 %v344_v18, %v343_v15  ;;  %v308_v20 = vmul.f32 0.0078125, %v306_v17  ;;  %v853_v15 = vld [vmem:[#allocation10 + $0x50] sm:$0xff]  ;;  %v854_v17 = vld [vmem:[#allocation10 + $0x58] sm:$0xff] }
 0x191   :  { %v1578_v18 = vpack.c.bf16 %v854_v17, %v853_v15 }
 0x192   :  { %v346_v21 = vmul.f32 0.0078125, %v345_v19  ;;  %1561 = vmatpush3.bf16.msra.mxu0 %v1558_v59  ;;  %v855_v19 = vld [vmem:[#allocation10 + $0x60] sm:$0xff] }
 0x193   :  { %1586 = vmatprep.subr.bf16.mxu0 %v1865_v43 }
 0x194   :  { %v348_v23 = vsel %vm347_vm1, %v308_v20, %v346_v21  ;;  %v856_v20 = vld [vmem:[#allocation10 + $0x68] sm:$0xff] }
 0x195   :  { %1346 = vmatmul.mubr.f32.vlgmr.msra.gmra.mrb[0].mxu1 %v348_v23  ;;  %v1581_v21 = vpack.c.bf16 %v856_v20, %v855_v19  ;;  %v857_v23 = vld [vmem:[#allocation10 + $0x70] sm:$0xff] }
 0x196   :  { %1436 = vmatprep.mubr.msk.f32.mxu1 %vm1866_vm0, %v1867_v61  ;;  %1564 = vmatpush3.bf16.msra.mxu1 %v1563_v60  ;;  %v1584_v26 = vpack.c.bf16 %v858_v25, %v857_v23 }
 0x197   :  { %1565 = vmatprep.subr.bf16.mxu1 %v1865_v43 }
 0x19a   :  { %1567 = vmatpush3.bf16.msra.mxu1 %v1566_v0 }
 0x19b   :  { %1568 = vmatprep.subr.bf16.mxu1 %v1865_v43 }
 0x19e   :  { %1570 = vmatpush3.bf16.msra.mxu1 %v1569_v5 }
 0x19f   :  { %1571 = vmatprep.subr.bf16.mxu1 %v1865_v43 }
 0x1a2   :  { %1573 = vmatpush3.bf16.msra.mxu1 %v1572_v10 }
 0x1a3   :  { %1574 = vmatprep.subr.bf16.mxu1 %v1865_v43 }
 0x1a6   :  { %1576 = vmatpush3.bf16.msra.mxu1 %v1575_v13 }
 0x1a7   :  { %1577 = vmatprep.subr.bf16.mxu1 %v1865_v43 }
 0x1aa   :  { %1579 = vmatpush3.bf16.msra.mxu1 %v1578_v18 }
 0x1ab   :  { %1580 = vmatprep.subr.bf16.mxu1 %v1865_v43 }
 0x1ae   :  { %1582 = vmatpush3.bf16.msra.mxu1 %v1581_v21 }
 0x1af   :  { %1583 = vmatprep.subr.bf16.mxu1 %v1865_v43 }
 0x1b2   :  { %1585 = vmatpush3.bf16.msra.mxu1 %v1584_v26 }
 0x268   :  { %v431_v31 = vpop.f32.mrb[0].mxu1 }
 0x269   :  { %v435_v33 = vmul.f32 %v431_v31, %v431_v31  ;;  %v2128_v34 = vrot.slane %v431_v31, %v2125_v29  ;;  %v1347_v35 = vpop.f32.mrb[1].mxu1 }
 0x26b   :  { %v437_v36 = vrot.slane %v435_v33, 7  ;;  %v447_v37 = vsub.f32 %v2036_v4, %v2128_v34  ;;  %v448_v39 = vsub.f32 %v2032_v2, %v2128_v34  ;;  %v449_v41 = vsub.f32 %v2044_v9, %v2128_v34 }
 0x26c   :  { %v450_v42 = vsub.f32 %v2042_v8, %v2128_v34  ;;  %v451_v44 = vsub.f32 %v2054_v16, %v2128_v34  ;;  %v452_v45 = vsub.f32 %v2051_v14, %v2128_v34  ;;  %v453_v46 = vsub.f32 %v2064_v24, %v2128_v34 }
 0x26d   :  { %v439_v48 = vsub.f32 %v431_v31, %v437_v36  ;;  %v454_v4 = vsub.f32 %v2061_v22, %v2128_v34  ;;  %v455_v2 = vsub.f32 %v2074_v32, %v2128_v34  ;;  %v456_v9 = vsub.f32 %v2071_v30, %v2128_v34 }
 0x26e   :  { %v457_v8 = vsub.f32 %v2084_v40, %v2128_v34  ;;  %v458_v16 = vsub.f32 %v2081_v38, %v2128_v34  ;;  %v459_v14 = vsub.f32 %v2094_v49, %v2128_v34  ;;  %v460_v24 = vsub.f32 %v2091_v47, %v2128_v34  ;;  %v2168_v38 = vld [vmem:[%s2361_s6] ss:$0 sm:$0xff] }
 0x26f   :  { %v440_v50 = vmax.f32 %v439_v48, 0.0  ;;  %v461_v22 = vsub.f32 %v2104_v57, %v2128_v34  ;;  %v462_v32 = vsub.f32 %v2101_v55, %v2128_v34  ;;  %v467_v40 = vsub.s32 1, %v2122_v28 }
 0x271   :  { %v463_v30 = vadd.f32 1e-05, %v440_v50 }
 0x273   :  { %1623 = vrsqrt.f32 %v463_v30 }
 0x27d   :  { %v1624_v51 = vpop.eup %1623 }
 0x27e   :  { %v2163_v52 = vrot.slane %v1624_v51, %v467_v40 }
 0x280   :  { %v469_v47 = vmul.f32 %v2163_v52, %v447_v37  ;;  %v470_v49 = vmul.f32 %v2163_v52, %v448_v39  ;;  %v471_v57 = vmul.f32 %v2163_v52, %v449_v41  ;;  %v472_v53 = vmul.f32 %v2163_v52, %v450_v42 }
 0x281   :  { %v473_v56 = vmul.f32 %v2163_v52, %v451_v44  ;;  %v474_v58 = vmul.f32 %v2163_v52, %v452_v45  ;;  %v475_v59 = vmul.f32 %v2163_v52, %v453_v46  ;;  %v476_v60 = vmul.f32 %v2163_v52, %v454_v4 }
 0x282   :  { %v489_v62 = vmul.f32 %v2168_v38, %v469_v47  ;;  %v490_v63 = vmul.f32 %v2168_v38, %v470_v49  ;;  %v491_v0 = vmul.f32 %v2168_v38, %v471_v57  ;;  %v492_v1 = vmul.f32 %v2168_v38, %v472_v53 }
 0x283   :  { %v493_v3 = vmul.f32 %v2168_v38, %v473_v56  ;;  %v494_v5 = vmul.f32 %v2168_v38, %v474_v58  ;;  %v495_v15 = vmul.f32 %v2168_v38, %v475_v59  ;;  %v496_v17 = vmul.f32 %v2168_v38, %v476_v60 }
 0x284   :  { %v509_v6 = vadd.f32 %v2177_v54, %v489_v62  ;;  %v510_v7 = vadd.f32 %v2177_v54, %v490_v63  ;;  %v511_v10 = vadd.f32 %v2177_v54, %v491_v0  ;;  %v512_v11 = vadd.f32 %v2177_v54, %v492_v1 }
 0x285   :  { %v513_v20 = vadd.f32 %v2177_v54, %v493_v3  ;;  %v514_v21 = vadd.f32 %v2177_v54, %v494_v5  ;;  %v477_v25 = vmul.f32 %v2163_v52, %v455_v2  ;;  %v478_v26 = vmul.f32 %v2163_v52, %v456_v9 }
 0x286   :  { %v2193_v12 = vmax.f32 %v509_v6, 0.0  ;;  %v2195_v13 = vmax.f32 %v510_v7, 0.0  ;;  %v2199_v18 = vmax.f32 %v511_v10, 0.0  ;;  %v2201_v19 = vmax.f32 %v512_v11, 0.0 }
 0x287   :  { %v479_v27 = vmul.f32 %v2163_v52, %v457_v8  ;;  %v480_v31 = vmul.f32 %v2163_v52, %v458_v16  ;;  %v481_v33 = vmul.f32 %v2163_v52, %v459_v14  ;;  %v482_v35 = vmul.f32 %v2163_v52, %v460_v24 }
 0x288   :  { %1380 = vmatprep.mubr.f32.mxu0 %v2193_v12  ;;  %v814_v23 = vadd.f32 %v2195_v13, %v2193_v12  ;;  %v483_v36 = vmul.f32 %v2163_v52, %v461_v22  ;;  %v497_v39 = vmul.f32 %v2168_v38, %v477_v25  ;;  %v498_v41 = vmul.f32 %v2168_v38, %v478_v26 }
 0x289   :  { %1381 = vmatmul.mubr.f32.vlgmr.msra.gmra.mrb[16].mxu0 %v2195_v13  ;;  %v499_v42 = vmul.f32 %v2168_v38, %v479_v27  ;;  %v2221_v44 = vmax.f32 %v513_v20, 0.0  ;;  %v515_v45 = vadd.f32 %v2177_v54, %v495_v15  ;;  %v500_v46 = vmul.f32 %v2168_v38, %v480_v31 }
 0x28a   :  { %1383 = vmatprep.mubr.f32.mxu0 %v2199_v18  ;;  %v815_v37 = vadd.f32 %v814_v23, %v2199_v18  ;;  %v501_v48 = vmul.f32 %v2168_v38, %v481_v33  ;;  %v517_v2 = vadd.f32 %v2177_v54, %v497_v39  ;;  %v518_v9 = vadd.f32 %v2177_v54, %v498_v41 }
 0x28b   :  { %v519_v8 = vadd.f32 %v2177_v54, %v499_v42  ;;  %v2231_v16 = vmax.f32 %v514_v21, 0.0  ;;  %v516_v14 = vadd.f32 %v2177_v54, %v496_v17  ;;  %v502_v24 = vmul.f32 %v2168_v38, %v482_v35  ;;  %v940_v42 = vld [vmem:[#allocation11] sm:$0xff] }
 0x28c   :  { %v816_v4 = vadd.f32 %v815_v37, %v2201_v19  ;;  %v2237_v22 = vmax.f32 %v517_v2, 0.0  ;;  %v2239_v30 = vmax.f32 %v518_v9, 0.0  ;;  %v520_v40 = vadd.f32 %v2177_v54, %v500_v46  ;;  %v944_v9 = vld [vmem:[#allocation11 + $0x20] sm:$0xff] }
 0x28d   :  { %1384 = vmatmul.mubr.f32.gmra.mrb[18].mxu0 %v2201_v19  ;;  %v2242_v51 = vmax.f32 %v515_v45, 0.0  ;;  %v521_v47 = vadd.f32 %v2177_v54, %v501_v48  ;;  %v503_v49 = vmul.f32 %v2168_v38, %v483_v36  ;;  %v2249_v56 = vmax.f32 %v519_v8, 0.0  ;;  %v941_v45 = vld [vmem:[#allocation11 + $0x8] sm:$0xff]  ;;  %v942_v48 = vld [vmem:[#allocation11 + $0x10] sm:$0xff] }
 0x28e   :  { %1386 = vmatprep.mubr.f32.mxu0 %v2221_v44  ;;  %v817_v50 = vadd.f32 %v816_v4, %v2221_v44  ;;  %v827_v53 = vadd.f32 %v2239_v30, %v2237_v22  ;;  %v484_v58 = vmul.f32 %v2163_v52, %v462_v32  ;;  %v2256_v59 = vmax.f32 %v516_v14, 0.0  ;;  %v943_v4 = vld [vmem:[#allocation11 + $0x18] sm:$0xff]  ;;  %v946_v14 = vld [vmem:[#allocation11 + $0x30] sm:$0xff] }
 0x28f   :  { %v522_v60 = vadd.f32 %v2177_v54, %v502_v24  ;;  %v2262_v0 = vmax.f32 %v520_v40, 0.0  ;;  %v2266_v34 = vmax.f32 %v521_v47, 0.0  ;;  %v523_v32 = vadd.f32 %v2177_v54, %v503_v49  ;;  %v947_v24 = vld [vmem:[#allocation11 + $0x38] sm:$0xff]  ;;  %v948_v40 = vld [vmem:[#allocation11 + $0x40] sm:$0xff]  ;;  %v949_v47 = vld [vmem:[#allocation11 + $0x48] sm:$0xff] }
 0x290   :  { %v818_v57 = vadd.f32 %v817_v50, %v2231_v16  ;;  %v828_v63 = vadd.f32 %v827_v53, %v2249_v56  ;;  %v504_v1 = vmul.f32 %v2168_v38, %v484_v58  ;;  %v1587_v46 = vpack.c.bf16 %v941_v45, %v940_v42  ;;  %v951_v53 = vld [vmem:[#allocation11 + $0x58] sm:$0xff] }
 0x291   :  { %1387 = vmatmul.mubr.f32.gmra.mrb[20].mxu0 %v2231_v16  ;;  %v2273_v5 = vmax.f32 %v522_v60, 0.0  ;;  %v2277_v10 = vmax.f32 %v523_v32, 0.0  ;;  %v1590_v2 = vpack.c.bf16 %v943_v4, %v942_v48  ;;  %v1596_v50 = vpack.c.bf16 %v947_v24, %v946_v14  ;;  %v952_v60 = vld [vmem:[#allocation11 + $0x60] sm:$0xff] }
 0x292   :  { %1389 = vmatprep.mubr.f32.mxu0 %v2242_v51  ;;  %v819_v62 = vadd.f32 %v818_v57, %v2242_v51  ;;  %v829_v55 = vadd.f32 %v828_v63, %v2262_v0  ;;  %v524_v6 = vadd.f32 %v2177_v54, %v504_v1  ;;  %1588 = vmatpush3.bf16.msra.mxu0 %v1587_v46  ;;  %v950_v57 = vld [vmem:[#allocation11 + $0x50] sm:$0xff] }
 0x293   :  { %1589 = vmatprep.subr.bf16.mxu0 %v1865_v43  ;;  %v1599_v49 = vpack.c.bf16 %v949_v47, %v948_v40  ;;  %v1602_v58 = vpack.c.bf16 %v951_v53, %v950_v57  ;;  %v954_v1 = vld [vmem:[#allocation11 + $0x70] sm:$0xff] }
 0x294   :  { %v820_v52 = vadd.f32 %v819_v62, %v2256_v59  ;;  %v830_v3 = vadd.f32 %v829_v55, %v2266_v34  ;;  %v2282_v17 = vmax.f32 %v524_v6, 0.0  ;;  %v953_v62 = vld [vmem:[#allocation11 + $0x68] sm:$0xff]  ;;  %v955_v55 = vld [vmem:[#allocation11 + $0x78] sm:$0xff] }
 0x295   :  { %1390 = vmatmul.mubr.f32.gmra.mrb[22].mxu0 %v2256_v59  ;;  %v1605_v63 = vpack.c.bf16 %v953_v62, %v952_v60  ;;  %v1608_v32 = vpack.c.bf16 %v955_v55, %v954_v1 }
 0x296   :  { %1392 = vmatprep.mubr.f32.mxu0 %v2237_v22  ;;  %v821_v7 = vrot.slane %v820_v52, 4  ;;  %v831_v38 = vadd.f32 %v830_v3, %v2273_v5  ;;  %1591 = vmatpush3.bf16.msra.mxu0 %v1590_v2 }
 0x297   :  { %1592 = vmatprep.subr.bf16.mxu0 %v1865_v43 }
 0x298   :  { %v822_v11 = vadd.f32 %v821_v7, %v820_v52  ;;  %v832_v15 = vadd.f32 %v831_v38, %v2277_v10 }
 0x299   :  { %1393 = vmatmul.mubr.f32.gmra.mrb[24].mxu0 %v2239_v30 }
 0x29a   :  { %1395 = vmatprep.mubr.f32.mxu0 %v2249_v56  ;;  %v823_v20 = vrot.slane %v822_v11, 2  ;;  %v833_v23 = vadd.f32 %v832_v15, %v2282_v17 }
 0x29c   :  { %v824_v21 = vadd.f32 %v823_v20, %v822_v11  ;;  %v834_v54 = vrot.slane %v833_v23, 4 }
 0x29d   :  { %1396 = vmatmul.mubr.f32.gmra.mrb[26].mxu0 %v2262_v0 }
 0x29e   :  { %1398 = vmatprep.mubr.f32.mxu0 %v2266_v34  ;;  %v825_v25 = vrot.slane %v824_v21, 1  ;;  %v835_v26 = vadd.f32 %v834_v54, %v833_v23 }
 0x2a0   :  { %v836_v27 = vrot.slane %v835_v26, 2  ;;  %v826_v31 = vadd.f32 %v825_v25, %v824_v21 }
 0x2a1   :  { %1399 = vmatmul.mubr.f32.gmra.mrb[28].mxu0 %v2273_v5 }
 0x2a2   :  { %1401 = vmatprep.mubr.f32.mxu0 %v2277_v10  ;;  %v837_v33 = vadd.f32 %v836_v27, %v835_v26  ;;  %v841_v37 = vmul.f32 0.015625, %v826_v31 }
 0x2a4   :  { %v838_v35 = vrot.slane %v837_v33, 1 }
 0x2a5   :  { %1402 = vmatmul.mubr.f32.gmra.mrb[30].mxu0 %v2282_v17 }
 0x2a6   :  { %1471 = vmatprep.mubr.msk.f32.mxu0 %vm1866_vm0, %v1867_v61  ;;  %v839_v36 = vadd.f32 %v838_v35, %v837_v33  ;;  %v945_v61 = vld [vmem:[#allocation11 + $0x28] sm:$0xff]  ;;  %v1140_v33 = vld [vmem:[%s2361_s6 + $0x2] ss:$0 sm:$0xff] }
 0x2a7   :  { %v1593_v8 = vpack.c.bf16 %v945_v61, %v944_v9 }
 0x2a8   :  { %v842_v39 = vmul.f32 0.015625, %v839_v36 }
 0x2a9   :  { %1594 = vmatpush3.bf16.msra.mxu0 %v1593_v8 }
 0x2aa   :  { %v867_v41 = vsel %vm866_vm2, %v842_v39, %v841_v37  ;;  %1595 = vmatprep.subr.bf16.mxu0 %v1865_v43 }
 0x2ab   :  { %1437 = vmatmul.mubr.f32.vlgmr.msra.gmra.mrb[2].mxu1 %v867_v41 }
 0x2ad   :  { %1597 = vmatpush3.bf16.msra.mxu0 %v1596_v50 }
 0x2ae   :  { %1598 = vmatprep.subr.bf16.mxu0 %v1865_v43 }
 0x2b1   :  { %1600 = vmatpush3.bf16.msra.mxu0 %v1599_v49 }
 0x2b2   :  { %1601 = vmatprep.subr.bf16.mxu0 %v1865_v43 }
 0x2b5   :  { %1603 = vmatpush3.bf16.msra.mxu0 %v1602_v58 }
 0x2b6   :  { %1604 = vmatprep.subr.bf16.mxu0 %v1865_v43 }
 0x2b9   :  { %1606 = vmatpush3.bf16.msra.mxu0 %v1605_v63 }
 0x2ba   :  { %1607 = vmatprep.subr.bf16.mxu0 %v1865_v43 }
 0x2bd   :  { %1609 = vmatpush3.bf16.msra.mxu0 %v1608_v32 }
 0x35c   :  { %v1382_v52 = vpop.f32.mrb[16].mxu0 }
 0x35d   :  { %v623_v3 = vpop.f32.mrb[17].mxu0  ;;  %v703_v41 = vsub.f32 0.0, %v1382_v52 }
 0x35e   :  { %v702_v45 = vsub.f32 0.0, %v623_v3 }
 0x35f   :  { %v720_v42 = vmul.f32 1.442695, %v703_v41 }
 0x360   :  { %v1385_v6 = vpop.f32.mrb[18].mxu0  ;;  %v718_v2 = vmul.f32 1.442695, %v702_v45 }
 0x361   :  { %v633_v7 = vpop.f32.mrb[19].mxu0  ;;  %v705_v46 = vsub.f32 0.0, %v1385_v6  ;;  %1625 = vpow2.f32 %v720_v42 }
 0x362   :  { %v704_v48 = vsub.f32 0.0, %v633_v7  ;;  %1627 = vpow2.f32 %v718_v2 }
 0x363   :  { %v724_v61 = vmul.f32 1.442695, %v705_v46 }
 0x364   :  { %v1388_v38 = vpop.f32.mrb[20].mxu0  ;;  %v722_v14 = vmul.f32 1.442695, %v704_v48 }
 0x365   :  { %v643_v11 = vpop.f32.mrb[21].mxu0  ;;  %v707_v4 = vsub.f32 0.0, %v1388_v38  ;;  %1629 = vpow2.f32 %v724_v61 }
 0x366   :  { %v706_v9 = vsub.f32 0.0, %v643_v11  ;;  %1631 = vpow2.f32 %v722_v14  ;;  %v1141_v11 = vld [vmem:[%s2361_s6 + $0x3] ss:$0 sm:$0xff]  ;;  %s1869_s6 = smov [#allocation13]  }
 0x367   :  { %v728_v50 = vmul.f32 1.442695, %v707_v4  ;;  %s1123_s10 = sshll.u32 %s1869_s6, 4  ;;  %s1124_s10 = int_to_ptr.vmem [resolvable:$true] %s1123_s10 }
 0x368   :  { %v1391_v15 = vpop.f32.mrb[22].mxu0  ;;  %v726_v47 = vmul.f32 1.442695, %v706_v9  ;;  %s1825_s11 = scalar_lea.vmem %s1124_s10, 2048  ;;  %p1830_p7 = scmp.lt.s32.totalorder %s1124_s10, %s1124_s10 }
 0x369   :  { %v653_v20 = vpop.f32.mrb[23].mxu0  ;;  %v709_v8 = vsub.f32 0.0, %v1391_v15  ;;  %1633 = vpow2.f32 %v728_v50  ;;  %p1826_p6 = scmp.ne.s32.totalorder %s1124_s10, %s1825_s11  ;;  %p1831_p8 = scmp.lt.s32.totalorder %s1825_s11, %s1825_s11 }
 0x36a   :  { %v708_v24 = vsub.f32 0.0, %v653_v20  ;;  %1635 = vpow2.f32 %v726_v47 }
 0x36b   :  { %v732_v57 = vmul.f32 1.442695, %v709_v8  ;;  %v1626_v55 = vpop.eup %1625  ;;  %p1832_p9 = por %p1831_p8, %p1830_p7 }
 0x36c   :  { %v1394_v21 = vpop.f32.mrb[24].mxu0  ;;  %v730_v58 = vmul.f32 1.442695, %v708_v24  ;;  %v751_v15 = vadd.f32 1.0, %v1626_v55 }
 0x36d   :  { %v663_v23 = vpop.f32.mrb[25].mxu0  ;;  %v711_v40 = vsub.f32 0.0, %v1394_v21  ;;  %1637 = vpow2.f32 %v732_v57  ;;  %p1833_p10 = pnand %p1832_p9, %p1826_p6 }
 0x36e   :  { %v710_v49 = vsub.f32 0.0, %v663_v23  ;;  %1639 = vpow2.f32 %v730_v58  ;;  %v1628_v23 = vpop.eup %1627 }
 0x36f   :  { %v736_v62 = vmul.f32 1.442695, %v711_v40 }
 0x370   :  { %v1397_v54 = vpop.f32.mrb[26].mxu0  ;;  %v734_v1 = vmul.f32 1.442695, %v710_v49 }
 0x371   :  { %v673_v25 = vpop.f32.mrb[27].mxu0  ;;  %v713_v53 = vsub.f32 0.0, %v1397_v54  ;;  %1641 = vpow2.f32 %v736_v62 }
 0x372   :  { %v712_v60 = vsub.f32 0.0, %v673_v25  ;;  %1643 = vpow2.f32 %v734_v1 }
 0x373   :  { %v740_v32 = vmul.f32 1.442695, %v713_v53 }
 0x374   :  { %v1400_v26 = vpop.f32.mrb[28].mxu0  ;;  %v738_v3 = vmul.f32 1.442695, %v712_v60 }
 0x375   :  { %v683_v27 = vpop.f32.mrb[29].mxu0  ;;  %v715_v63 = vsub.f32 0.0, %v1400_v26  ;;  %1645 = vpow2.f32 %v740_v32 }
 0x376   :  { %v714_v52 = vsub.f32 0.0, %v683_v27  ;;  %1647 = vpow2.f32 %v738_v3  ;;  %v1630_v27 = vpop.eup %1629 }
 0x377   :  { %v744_v7 = vmul.f32 1.442695, %v715_v63 }
 0x378   :  { %v1403_v31 = vpop.f32.mrb[30].mxu0  ;;  %v742_v20 = vmul.f32 1.442695, %v714_v52 }
 0x379   :  { %v693_v43 = vpop.f32.mrb[31].mxu0  ;;  %v717_v6 = vsub.f32 0.0, %v1403_v31  ;;  %1649 = vpow2.f32 %v744_v7  ;;  %v1868_v7 = vmov 1966171168  }
 0x37a   :  { %v716_v38 = vsub.f32 0.0, %v693_v43  ;;  %1651 = vrcp.f32 %v751_v15 }
 0x37b   :  { %v748_v54 = vmul.f32 1.442695, %v717_v6  ;;  %1653 = vpow2.f32 %v742_v20 }
 0x37c   :  { %v746_v31 = vmul.f32 1.442695, %v716_v38  ;;  %v1039_v38 = vunpack.c.l.s4 %v1868_v7 }
 0x37d   :  { %1655 = vpow2.f32 %v748_v54 }
 0x37e   :  { %v935_v35 = vpop.f32.mrb[2].mxu1  ;;  %1657 = vpow2.f32 %v746_v31  ;;  %v1040_v54 = vunpack.c.0.s8 %v1039_v38 }
 0x37f   :  { %v936_v36 = vadd.f32 %v1140_v33, %v935_v35  ;;  %v1438_v37 = vpop.f32.mrb[3].mxu1  ;;  %v1632_v33 = vpop.eup %1631 }
 0x380   :  { %v1634_v35 = vpop.eup %1633  ;;  %v752_v45 = vadd.f32 1.0, %v1632_v33  ;;  %v1043_v33 = vsub.s32 %v1040_v54, %v2122_v28 }
 0x381   :  { %v939_v39 = vmax.f32 %v936_v36, 0.0  ;;  %v750_v36 = vadd.f32 1.0, %v1628_v23  ;;  %v1636_v37 = vpop.eup %1635  ;;  %v755_v48 = vadd.f32 1.0, %v1634_v35 }
 0x382   :  { %v1638_v42 = vpop.eup %1637  ;;  %v754_v2 = vadd.f32 1.0, %v1636_v37 }
 0x383   :  { %1472 = vmatmul.mubr.f32.vlgmr.msra.gmra.mrb[32].mxu0 %v939_v39  ;;  %v753_v39 = vadd.f32 1.0, %v1630_v27  ;;  %v1640_v46 = vpop.eup %1639  ;;  %v757_v61 = vadd.f32 1.0, %v1638_v42 }
 0x384   :  { %v1642_v4 = vpop.eup %1641  ;;  %v756_v14 = vadd.f32 1.0, %v1640_v46 }
 0x385   :  { %v1644_v9 = vpop.eup %1643  ;;  %v759_v50 = vadd.f32 1.0, %v1642_v4 }
 0x386   :  { %v1646_v8 = vpop.eup %1645  ;;  %v758_v47 = vadd.f32 1.0, %v1644_v9 }
 0x387   :  { %v1648_v24 = vpop.eup %1647  ;;  %v761_v57 = vadd.f32 1.0, %v1646_v8 }
 0x388   :  { %v1650_v40 = vpop.eup %1649  ;;  %v760_v58 = vadd.f32 1.0, %v1648_v24 }
 0x389   :  { %v1652_v49 = vpop.eup %1651  ;;  %v763_v62 = vadd.f32 1.0, %v1650_v40 }
 0x38a   :  { %v1654_v53 = vpop.eup %1653  ;;  %v799_v42 = vmul.f32 %v1652_v49, %v2195_v13 }
 0x38b   :  { %v1656_v60 = vpop.eup %1655  ;;  %v762_v55 = vadd.f32 1.0, %v1654_v53 }
 0x38c   :  { %v1658_v63 = vpop.eup %1657  ;;  %v765_v52 = vadd.f32 1.0, %v1656_v60 }
 0x456   :  { %v1027_v21 = vpop.f32.mrb[32].mxu0 }
 0x457   :  { %v1028_v25 = vadd.f32 %v1141_v11, %v1027_v21  ;;  %v1473_v26 = vpop.f32.mrb[33].mxu0  ;;  %v764_v11 = vadd.f32 1.0, %v1658_v63 }
 0x459   :  { %v1031_v43 = vsub.f32 0.0, %v1028_v25 }
 0x45b   :  { %v1032_v41 = vmul.f32 1.442695, %v1031_v43 }
 0x45d   :  { %1659 = vpow2.f32 %v1032_v41 }
 0x45e   :  { %1661 = vrcp.f32 %v750_v36 }
 0x45f   :  { %1663 = vrcp.f32 %v753_v39 }
 0x460   :  { %1665 = vrcp.f32 %v752_v45 }
 0x461   :  { %1667 = vrcp.f32 %v755_v48 }
 0x462   :  { %1669 = vrcp.f32 %v754_v2 }
 0x463   :  { %1671 = vrcp.f32 %v757_v61 }
 0x464   :  { %1673 = vrcp.f32 %v756_v14 }
 0x465   :  { %1675 = vrcp.f32 %v759_v50 }
 0x466   :  { %1677 = vrcp.f32 %v758_v47 }
 0x467   :  { %v1660_v1 = vpop.eup %1659  ;;  %1679 = vrcp.f32 %v761_v57 }
 0x468   :  { %v1662_v32 = vpop.eup %1661  ;;  %1681 = vrcp.f32 %v760_v58  ;;  %v1034_v3 = vadd.f32 1.0, %v1660_v1 }
 0x469   :  { %v1664_v6 = vpop.eup %1663  ;;  %1683 = vrcp.f32 %v763_v62  ;;  %v798_v45 = vmul.f32 %v1662_v32, %v2193_v12 }
 0x46a   :  { %v1666_v15 = vpop.eup %1665  ;;  %1685 = vrcp.f32 %v1034_v3  ;;  %v801_v46 = vmul.f32 %v1664_v6, %v2201_v19 }
 0x46b   :  { %v1668_v20 = vpop.eup %1667  ;;  %1687 = vrcp.f32 %v762_v55  ;;  %v800_v48 = vmul.f32 %v1666_v15, %v2199_v18 }
 0x46c   :  { %v1670_v21 = vpop.eup %1669  ;;  %1689 = vrcp.f32 %v765_v52  ;;  %v803_v2 = vmul.f32 %v1668_v20, %v2231_v16 }
 0x46d   :  { %v1672_v23 = vpop.eup %1671  ;;  %1691 = vrcp.f32 %v764_v11  ;;  %v802_v9 = vmul.f32 %v1670_v21, %v2221_v44 }
 0x46e   :  { %v1674_v25 = vpop.eup %1673  ;;  %v805_v8 = vmul.f32 %v1672_v23, %v2256_v59 }
 0x46f   :  { %v1676_v26 = vpop.eup %1675  ;;  %v804_v14 = vmul.f32 %v1674_v25, %v2242_v51 }
 0x470   :  { %v1678_v27 = vpop.eup %1677  ;;  %v807_v24 = vmul.f32 %v1676_v26, %v2239_v30 }
 0x471   :  { %v1680_v31 = vpop.eup %1679  ;;  %v806_v50 = vmul.f32 %v1678_v27, %v2237_v22 }
 0x472   :  { %v1682_v43 = vpop.eup %1681  ;;  %v809_v40 = vmul.f32 %v1680_v31, %v2262_v0 }
 0x473   :  { %v1684_v35 = vpop.eup %1683  ;;  %v808_v47 = vmul.f32 %v1682_v43, %v2249_v56 }
 0x474   :  { %v1686_v36 = vpop.eup %1685  ;;  %v811_v53 = vmul.f32 %v1684_v35, %v2273_v5 }
 0x475   :  { %v1688_v37 = vpop.eup %1687  ;;  %v1044_v39 = vrot.slane %v1686_v36, %v1043_v33 }
 0x476   :  { %v1690_v41 = vpop.eup %1689  ;;  %v810_v58 = vmul.f32 %v1688_v37, %v2266_v34 }
 0x477   :  { %v1692_v4 = vpop.eup %1691  ;;  %v1045_v28 = vcombine.high %v1044_v39, %v1044_v39  ;;  %v1052_v61 = vrot.slane %v1044_v39, %v1043_v33  ;;  %v813_v60 = vmul.f32 %v1690_v41, %v2282_v17 }
 0x478   :  { %v812_v62 = vmul.f32 %v1692_v4, %v2277_v10 }
 0x479   :  { %v1059_v49 = vrot.slane %v1045_v28, %v1043_v33  ;;  %v1063_v57 = vrot.slane %v1052_v61, %v2125_v29 }
 0x47b   :  { %v1067_v63 = vrot.slane %v1059_v49, %v2125_v29  ;;  %v1070_v1 = vmul.f32 %v1063_v57, %v2193_v12  ;;  %v1071_v55 = vmul.f32 %v1063_v57, %v2195_v13  ;;  %v1072_v32 = vmul.f32 %v1063_v57, %v2199_v18 }
 0x47c   :  { %v1073_v52 = vmul.f32 %v1063_v57, %v2201_v19  ;;  %v1074_v3 = vmul.f32 %v1063_v57, %v2221_v44  ;;  %v1075_v6 = vmul.f32 %v1063_v57, %v2231_v16  ;;  %v1076_v7 = vmul.f32 %v1063_v57, %v2242_v51 }
 0x47d   :  { %v1077_v38 = vmul.f32 %v1063_v57, %v2256_v59  ;;  %v1078_v11 = vmul.f32 %v1067_v63, %v2237_v22  ;;  %v1079_v29 = vmul.f32 %v1067_v63, %v2239_v30  ;;  %v1080_v12 = vmul.f32 %v1067_v63, %v2249_v56 }
 0x47e   :  { %v1081_v13 = vmul.f32 %v1067_v63, %v2262_v0  ;;  %v1082_v18 = vmul.f32 %v1067_v63, %v2266_v34  ;;  %v1083_v19 = vmul.f32 %v1067_v63, %v2273_v5  ;;  %v1084_v44 = vmul.f32 %v1067_v63, %v2277_v10 }
 0x47f   :  { %v1085_v16 = vmul.f32 %v1067_v63, %v2282_v17  ;;  %v1086_v15 = vadd.f32 %v1070_v1, %v798_v45  ;;  %v1087_v51 = vadd.f32 %v1071_v55, %v799_v42  ;;  %v1088_v20 = vadd.f32 %v1072_v32, %v800_v48 }
 0x480   :  { %v1089_v59 = vadd.f32 %v1073_v52, %v801_v46  ;;  %v1090_v21 = vadd.f32 %v1074_v3, %v802_v9  ;;  %v1091_v22 = vadd.f32 %v1075_v6, %v803_v2  ;;  %v1092_v23 = vadd.f32 %v1076_v7, %v804_v14 }
 0x481   :  { %v1093_v30 = vadd.f32 %v1077_v38, %v805_v8  ;;  %v1094_v56 = vadd.f32 %v1078_v11, %v806_v50  ;;  %v1095_v0 = vadd.f32 %v1079_v29, %v807_v24  ;;  %v1096_v54 = vadd.f32 %v1080_v12, %v808_v47  ;;  %1102 = vst [vmem:[#allocation13] sm:$0xff] %v1086_v15 }
 0x482   :  { %1103 = vst [vmem:[#allocation13 + $0x8] sm:$0xff] %v1087_v51  ;;  %1104 = vst [vmem:[#allocation13 + $0x10] sm:$0xff] %v1088_v20  ;;  %v1097_v34 = vadd.f32 %v1081_v13, %v809_v40  ;;  %v1098_v5 = vadd.f32 %v1082_v18, %v810_v58  ;;  %v1099_v10 = vadd.f32 %v1083_v19, %v811_v53 }
 0x483   :  { %v1100_v17 = vadd.f32 %v1084_v44, %v812_v62  ;;  %1105 = vst [vmem:[#allocation13 + $0x18] sm:$0xff] %v1089_v59  ;;  %1106 = vst [vmem:[#allocation13 + $0x20] sm:$0xff] %v1090_v21  ;;  %v1101_v25 = vadd.f32 %v1085_v16, %v813_v60 }
 0x484   :  { %1107 = vst [vmem:[#allocation13 + $0x28] sm:$0xff] %v1091_v22  ;;  %1108 = vst [vmem:[#allocation13 + $0x30] sm:$0xff] %v1092_v23 }
 0x485   :  { %1109 = vst [vmem:[#allocation13 + $0x38] sm:$0xff] %v1093_v30  ;;  %1110 = vst [vmem:[#allocation13 + $0x40] sm:$0xff] %v1094_v56 }
 0x486   :  { %1111 = vst [vmem:[#allocation13 + $0x48] sm:$0xff] %v1095_v0  ;;  %1112 = vst [vmem:[#allocation13 + $0x50] sm:$0xff] %v1096_v54 }
 0x487   :  { %1113 = vst [vmem:[#allocation13 + $0x58] sm:$0xff] %v1097_v34  ;;  %1114 = vst [vmem:[#allocation13 + $0x60] sm:$0xff] %v1098_v5 }
 0x488   :  { %1115 = vst [vmem:[#allocation13 + $0x68] sm:$0xff] %v1099_v10  ;;  %1116 = vst [vmem:[#allocation13 + $0x70] sm:$0xff] %v1100_v17 }
 0x489   :  { %1117 = vst [vmem:[#allocation13 + $0x78] sm:$0xff] %v1101_v25 }
 0x48a   :  { %1836 = shalt.err (!%p1833_p10)
}
 0x48b   :  { %s1837_s16 = scalar_lea.hbm %s2362_s7, 2048 }
 0x48c   :  { %p1838_p11 = scmp.ne.s32.totalorder %s2362_s7, %s1837_s16  ;;  %p1841_p12 = scmp.lt.u32.totalorder %s1837_s16, %s2362_s7 }
 0x48e   :  { %p1843_p13 = pnand %p1841_p12, %p1838_p11 }
 0x490   :  { %1846 = shalt.err (!%p1843_p13)
}
 0x491   :  { %1129 = dma.vmem_to_hbm [thread:$0]  %s1124_s10, 2048, %s2362_s7, [#allocation4], %s1859_s13, %s1859_s13, %s1860_s14  }
 0x492   :  { %1855 = dma.done.wait [#allocation4], 2048  }
 0x493   :  { %1856 = vsyncadd [#allocation4], 4294965248 }
 0x494   :  { %1133 = vsyncpa [#allocation3], 1 }
 0x495   :  { %1134 = vsyncpa [#allocation6], 1 }
 0x496   :  { %1135 = vsyncpa [#allocation9], 1 }
 0x497   :  { %1136 = vsyncpa [#allocation12], 1 }
 0x498   :  { %1137 = vsyncpa [#allocation4], 1 }

</bundles_post_ra>
